<compile_context>
chip_gen: v5e
topology: v5e:2x2
jax: 0.10.0
libtpu: 0.0.40
codegen_flags: <defaults>
</compile_context>

<pallas_src>
import functools

import jax
import jax.numpy as jnp
from jax.experimental import pallas as pl
from jax.experimental.pallas import tpu as pltpu


def _round_up(v, m):
    return ((v + m - 1) // m) * m


def _bigru_attn_kernel(meta, x_ref, slab_ref, out_ref):
    """Whole forward pass on one grid point (all operands fit VMEM)."""
    GPAD = meta["gpad"]            # per-gate lane block: 2H padded to 128
    GW = 3 * GPAD                  # fused gate width, columns [r | z | n]
    ATT = meta["att"]              # attention column block width (128)
    cp = meta["cp"]                # padded class lanes (multiple of 128)
    L = meta["num_layers"]
    rows_w0 = meta["rows_w0"]
    r_bias, r_head, r_hbias = meta["r_bias"], meta["r_head"], meta["r_hbias"]

    def gru_layer(inp, w, bg, bhn):
        # Both directions fused into one MXU dot; h0 == 0 so W_hh never appears.
        g = jnp.dot(inp, w, preferred_element_type=jnp.float32) + bg
        r = jax.nn.sigmoid(g[:, 0:GPAD])                  # whole-vreg slices
        z = jax.nn.sigmoid(g[:, GPAD:2 * GPAD])
        n = jnp.tanh(g[:, 2 * GPAD:3 * GPAD] + r * bhn)   # b_hn stays r-gated
        # Pad lanes: (1 - sigmoid(0)) * tanh(0 + 0.5*0) == 0 -> h stays clean.
        return (1.0 - z) * n                              # (N, GPAD)

    lb = slab_ref[r_bias:r_bias + meta["rows_bias"], :]   # all layer biases
    h = gru_layer(x_ref[...], slab_ref[0:rows_w0, 0:GW],
                  lb[0:1, 0:GW], lb[1:2, 0:GPAD])
    for l in range(1, L):                                 # unrolled at trace
        rw = rows_w0 + (l - 1) * GPAD
        h = gru_layer(h, slab_ref[rw:rw + GPAD, 0:GW],
                      lb[2 * l:2 * l + 1, 0:GW],
                      lb[2 * l + 1:2 * l + 2, 0:GPAD])

    # Head: ONE MXU dot covering fc1@fc2 (Dropout p=0, no activation between)
    # and the attention dot (w_attn replicated across a 128-lane column block).
    gh = jnp.dot(h, slab_ref[r_head:r_head + GPAD, 0:cp + ATT],
                 preferred_element_type=jnp.float32)      # (N, cp + 128)

    # Attention with seq_len == 1 collapses to one scalar scale S/(S + 1e-10).
    # eij = tanh(.) is bounded in [-1, 1] so exp needs no max-subtraction.
    a = jnp.exp(jnp.tanh(gh[:, cp:cp + ATT]))             # lanes all equal
    s = jnp.sum(a, axis=0, keepdims=True)                 # (1, ATT) = S
    scale = s / (s + 1e-10)                               # exact scalar scale
    scale = scale if cp == ATT else scale[:, 0:1]
    bf = slab_ref[r_hbias:r_hbias + 1, 0:cp]              # b_fc1 @ W2 + b_fc2
    out_ref[...] = gh[:, 0:cp] * scale + bf               # lane-dense store


def bigru_attn_forward(x, slab, meta):
    n = x.shape[0]
    rows_w0 = meta["rows_w0"]
    if x.shape[1] < rows_w0:                              # 8-sublane-align K
        x = jnp.pad(x, ((0, 0), (0, rows_w0 - x.shape[1])))
    vmem = pl.BlockSpec(memory_space=pltpu.MemorySpace.VMEM)
    out_pad = pl.pallas_call(
        functools.partial(_bigru_attn_kernel, meta),
        out_shape=jax.ShapeDtypeStruct((n, meta["cp"]), jnp.float32),
        in_specs=[vmem, vmem],                            # exactly 2 input DMAs
        out_specs=vmem,
    )(x, slab)
    return out_pad[:, :meta["num_classes"]]


def _uniform(key, shape, bound):
    return jax.random.uniform(key, shape, jnp.float32, -bound, bound)


def init_raw_params(key, input_size, hidden_size, num_layers, lin_hidden,
                    num_classes):
    """PyTorch-layout parameters with matching init distributions."""
    H = hidden_size
    k = 1.0 / float(H) ** 0.5
    raw = {"gru": []}
    for l in range(num_layers):
        in_l = input_size if l == 0 else 2 * H
        layer = {}
        for d in ("f", "b"):
            key, k0, k1, k2, k3 = jax.random.split(key, 5)
            layer[d] = {
                "w_ih": _uniform(k0, (3 * H, in_l), k),
                "w_hh": _uniform(k1, (3 * H, H), k),      # inert: h0 == 0
                "b_ih": _uniform(k2, (3 * H,), k),
                "b_hh": _uniform(k3, (3 * H,), k),
            }
        raw["gru"].append(layer)
    key, ka, k1w, k1b, k2w, k2b = jax.random.split(key, 6)
    raw["w_attn"] = _uniform(ka, (2 * H, 1), 6.0 ** 0.5)  # kaiming, fan_in=1
    b1 = 1.0 / float(2 * H) ** 0.5
    raw["fc1_w"] = _uniform(k1w, (lin_hidden, 2 * H), b1)
    raw["fc1_b"] = _uniform(k1b, (lin_hidden,), b1)
    b2 = 1.0 / float(lin_hidden) ** 0.5
    raw["fc2_w"] = _uniform(k2w, (num_classes, lin_hidden), b2)
    raw["fc2_b"] = _uniform(k2b, (num_classes,), b2)
    return raw


def pack_params(raw, input_size, hidden_size, num_layers, lin_hidden,
                num_classes):
    """Host-side layout: fuse directions + fc1.fc2 + attention into one slab."""
    H = hidden_size
    H2 = 2 * H
    GPAD = _round_up(H2, 128)                 # lane-aligned per-gate block
    GW = 3 * GPAD
    ATT = 128                                 # attention column block
    cp = _round_up(max(num_classes, 1), 128)  # lane-dense class dim
    WS = max(GW, cp + ATT)                    # common slab lane width

    rows_w0 = _round_up(input_size, 8)
    rows_bias = _round_up(2 * num_layers, 8)
    r_bias = rows_w0 + (num_layers - 1) * GPAD
    r_head = r_bias + rows_bias
    r_hbias = r_head + GPAD
    total_rows = r_hbias + 8

    slab = jnp.zeros((total_rows, WS), jnp.float32)

    def fused_layer(layer, in_l):
        w = jnp.zeros((in_l, GW), jnp.float32)
        bg = jnp.zeros((GW,), jnp.float32)
        for g in range(3):                    # PyTorch gate order r, z, n
            for d_i, d in enumerate(("f", "b")):
                base = g * GPAD + d_i * H
                w = w.at[:, base:base + H].set(
                    layer[d]["w_ih"][g * H:(g + 1) * H, :].T)
                b = layer[d]["b_ih"][g * H:(g + 1) * H]
                if g < 2:                     # r, z: fold in b_hh
                    b = b + layer[d]["b_hh"][g * H:(g + 1) * H]
                bg = bg.at[base:base + H].set(b)
        bhn = jnp.zeros((GPAD,), jnp.float32)
        bhn = bhn.at[0:H].set(layer["f"]["b_hh"][2 * H:])
        bhn = bhn.at[H:H2].set(layer["b"]["b_hh"][2 * H:])
        return w, bg, bhn

    w0, bg0, bhn0 = fused_layer(raw["gru"][0], input_size)
    slab = slab.at[0:input_size, 0:GW].set(w0)
    slab = slab.at[r_bias + 0, 0:GW].set(bg0)
    slab = slab.at[r_bias + 1, 0:GPAD].set(bhn0)
    for l in range(1, num_layers):
        wl, bgl, bhnl = fused_layer(raw["gru"][l], H2)
        rw = rows_w0 + (l - 1) * GPAD
        slab = slab.at[rw:rw + H2, 0:GW].set(wl)
        slab = slab.at[r_bias + 2 * l, 0:GW].set(bgl)
        slab = slab.at[r_bias + 2 * l + 1, 0:GPAD].set(bhnl)

    # Head: fc1 @ fc2 fused (Dropout p=0, no nonlinearity between) plus the
    # attention vector replicated into a lane-aligned column block.
    wf = raw["fc1_w"].T @ raw["fc2_w"].T                  # (2H, C)
    bf = raw["fc1_b"] @ raw["fc2_w"].T + raw["fc2_b"]     # (C,)
    slab = slab.at[r_head:r_head + H2, 0:num_classes].set(wf)
    slab = slab.at[r_head:r_head + H2, cp:cp + ATT].set(
        jnp.tile(raw["w_attn"][:, 0:1], (1, ATT)))
    slab = slab.at[r_hbias, 0:num_classes].set(bf)

    meta = dict(gpad=GPAD, att=ATT, cp=cp, num_classes=num_classes,
                num_layers=num_layers, rows_w0=rows_w0, rows_bias=rows_bias,
                r_bias=r_bias, r_head=r_head, r_hbias=r_hbias)
    return slab, meta


def reference_forward(x, raw, hidden_size, num_layers):
    """Pure-JAX replica of the PyTorch forward (seq_len = 1, h0 = 0)."""
    H = hidden_size

    def gru_dir(inp, p):
        gi = inp @ p["w_ih"].T + p["b_ih"]
        bh = p["b_hh"]                              # W_hh @ h0 == 0
        r = jax.nn.sigmoid(gi[:, :H] + bh[:H])
        z = jax.nn.sigmoid(gi[:, H:2 * H] + bh[H:2 * H])
        n = jnp.tanh(gi[:, 2 * H:] + r * bh[2 * H:])
        return (1.0 - z) * n

    h = x
    for l in range(num_layers):
        layer = raw["gru"][l]
        h = jnp.concatenate([gru_dir(h, layer["f"]), gru_dir(h, layer["b"])],
                            axis=-1)
    n_rows = h.shape[0]
    # Attention, including the PyTorch seq_len == 1 broadcasting behaviour.
    eij = jnp.tanh((h @ raw["w_attn"]).reshape(1, n_rows))      # (1, N)
    a = jnp.exp(eij)
    a = a / (jnp.sum(a, axis=1, keepdims=True) + 1e-10)
    weighted = h[:, None, :] * a[:, :, None]                    # (N, N, 2H)
    attn = jnp.sum(weighted, axis=1)                            # (N, 2H)
    y = attn @ raw["fc1_w"].T + raw["fc1_b"]
    # Dropout(p=0.0) skipped, as in the PyTorch forward.
    return y @ raw["fc2_w"].T + raw["fc2_b"]


if __name__ == "__main__":
    # hidden_sizes = [gru_hidden, linear_hidden]
    input_size, hidden_size, num_layers = 16, 32, 2
    lin_hidden, num_classes = 64, 4
    batch = 8

    key = jax.random.PRNGKey(0)
    kx, kp = jax.random.split(key)
    x = jax.random.normal(kx, (batch, input_size), dtype=jnp.float32)
    raw = init_raw_params(kp, input_size, hidden_size, num_layers, lin_hidden,
                          num_classes)
    slab, meta = pack_params(raw, input_size, hidden_size, num_layers,
                             lin_hidden, num_classes)

    out = bigru_attn_forward(x, slab, meta)
    out = jax.block_until_ready(out)
    ref = reference_forward(x, raw, hidden_size, num_layers)

    assert out.shape == (batch, num_classes)
    assert out.dtype == jnp.float32
    max_err = float(jnp.max(jnp.abs(out - ref)))
    assert max_err < 1e-2, f"kernel vs reference mismatch: {max_err}"
    print("KERNEL_OK")
</pallas_src>

<mosaic_0001>
module attributes {stable_mosaic.version = 11 : i64} {
  func.func @_bigru_attn_kernel(%arg0: memref<8x16xf32, #tpu.memory_space<vmem>>, %arg1: memref<288x384xf32, #tpu.memory_space<vmem>>, %arg2: memref<8x128xf32, #tpu.memory_space<vmem>>) attributes {dimension_semantics = [], scalar_prefetch = 0 : i64, scratch_operands = 0 : i64, tpu.core_type = #tpu.core_type<tc>} {
    %c144 = arith.constant 144 : index
    %c0 = arith.constant 0 : index
    %0 = vector.load %arg1[%c144, %c0] : memref<288x384xf32, #tpu.memory_space<vmem>>, vector<8x384xf32>
    %c0_0 = arith.constant 0 : index
    %c0_1 = arith.constant 0 : index
    %1 = vector.load %arg0[%c0_0, %c0_1] : memref<8x16xf32, #tpu.memory_space<vmem>>, vector<8x16xf32>
    %c0_2 = arith.constant 0 : index
    %c0_3 = arith.constant 0 : index
    %2 = vector.load %arg1[%c0_2, %c0_3] : memref<288x384xf32, #tpu.memory_space<vmem>>, vector<16x384xf32>
    %3 = vector.extract_strided_slice %0 {offsets = [0, 0], sizes = [1, 384], strides = [1, 1]} : vector<8x384xf32> to vector<1x384xf32>
    %4 = vector.extract_strided_slice %0 {offsets = [1, 0], sizes = [1, 128], strides = [1, 1]} : vector<8x384xf32> to vector<1x128xf32>
    %cst = arith.constant dense<0.000000e+00> : vector<8x384xf32>
    %5 = tpu.matmul %1, %2, %cst {dimension_numbers = #tpu.dot_dimension_numbers<[1], [0], [0], [1], [0, 0, 1, 1], [], []>} : vector<8x16xf32>, vector<16x384xf32>, vector<8x384xf32> -> vector<8x384xf32>
    %6 = vector.broadcast %3 : vector<1x384xf32> to vector<8x384xf32>
    %7 = arith.addf %5, %6 : vector<8x384xf32>
    %8 = vector.extract_strided_slice %7 {offsets = [0, 0], sizes = [8, 128], strides = [1, 1]} : vector<8x384xf32> to vector<8x128xf32>
    %9 = arith.negf %8 : vector<8x128xf32>
    %10 = math.exp %9 : vector<8x128xf32>
    %cst_4 = arith.constant 1.000000e+00 : f32
    %11 = vector.broadcast %cst_4 : f32 to vector<8x128xf32>
    %12 = arith.addf %11, %10 : vector<8x128xf32>
    %13 = arith.divf %11, %12 : vector<8x128xf32>
    %14 = vector.extract_strided_slice %7 {offsets = [0, 128], sizes = [8, 128], strides = [1, 1]} : vector<8x384xf32> to vector<8x128xf32>
    %15 = arith.negf %14 : vector<8x128xf32>
    %16 = math.exp %15 : vector<8x128xf32>
    %cst_5 = arith.constant 1.000000e+00 : f32
    %17 = vector.broadcast %cst_5 : f32 to vector<8x128xf32>
    %18 = arith.addf %17, %16 : vector<8x128xf32>
    %19 = arith.divf %17, %18 : vector<8x128xf32>
    %20 = vector.extract_strided_slice %7 {offsets = [0, 256], sizes = [8, 128], strides = [1, 1]} : vector<8x384xf32> to vector<8x128xf32>
    %21 = vector.broadcast %4 : vector<1x128xf32> to vector<8x128xf32>
    %22 = arith.mulf %13, %21 : vector<8x128xf32>
    %23 = arith.addf %20, %22 : vector<8x128xf32>
    %24 = math.tanh %23 : vector<8x128xf32>
    %cst_6 = arith.constant 1.000000e+00 : f32
    %25 = vector.broadcast %cst_6 : f32 to vector<8x128xf32>
    %26 = arith.subf %25, %19 : vector<8x128xf32>
    %27 = arith.mulf %26, %24 : vector<8x128xf32>
    %c16 = arith.constant 16 : index
    %c0_7 = arith.constant 0 : index
    %28 = vector.load %arg1[%c16, %c0_7] : memref<288x384xf32, #tpu.memory_space<vmem>>, vector<128x384xf32>
    %29 = vector.extract_strided_slice %0 {offsets = [2, 0], sizes = [1, 384], strides = [1, 1]} : vector<8x384xf32> to vector<1x384xf32>
    %30 = vector.extract_strided_slice %0 {offsets = [3, 0], sizes = [1, 128], strides = [1, 1]} : vector<8x384xf32> to vector<1x128xf32>
    %cst_8 = arith.constant dense<0.000000e+00> : vector<8x384xf32>
    %31 = tpu.matmul %27, %28, %cst_8 {dimension_numbers = #tpu.dot_dimension_numbers<[1], [0], [0], [1], [0, 0, 1, 1], [], []>} : vector<8x128xf32>, vector<128x384xf32>, vector<8x384xf32> -> vector<8x384xf32>
    %32 = vector.broadcast %29 : vector<1x384xf32> to vector<8x384xf32>
    %33 = arith.addf %31, %32 : vector<8x384xf32>
    %34 = vector.extract_strided_slice %33 {offsets = [0, 0], sizes = [8, 128], strides = [1, 1]} : vector<8x384xf32> to vector<8x128xf32>
    %35 = arith.negf %34 : vector<8x128xf32>
    %36 = math.exp %35 : vector<8x128xf32>
    %cst_9 = arith.constant 1.000000e+00 : f32
    %37 = vector.broadcast %cst_9 : f32 to vector<8x128xf32>
    %38 = arith.addf %37, %36 : vector<8x128xf32>
    %39 = arith.divf %37, %38 : vector<8x128xf32>
    %40 = vector.extract_strided_slice %33 {offsets = [0, 128], sizes = [8, 128], strides = [1, 1]} : vector<8x384xf32> to vector<8x128xf32>
    %41 = arith.negf %40 : vector<8x128xf32>
    %42 = math.exp %41 : vector<8x128xf32>
    %cst_10 = arith.constant 1.000000e+00 : f32
    %43 = vector.broadcast %cst_10 : f32 to vector<8x128xf32>
    %44 = arith.addf %43, %42 : vector<8x128xf32>
    %45 = arith.divf %43, %44 : vector<8x128xf32>
    %46 = vector.extract_strided_slice %33 {offsets = [0, 256], sizes = [8, 128], strides = [1, 1]} : vector<8x384xf32> to vector<8x128xf32>
    %47 = vector.broadcast %30 : vector<1x128xf32> to vector<8x128xf32>
    %48 = arith.mulf %39, %47 : vector<8x128xf32>
    %49 = arith.addf %46, %48 : vector<8x128xf32>
    %50 = math.tanh %49 : vector<8x128xf32>
    %cst_11 = arith.constant 1.000000e+00 : f32
    %51 = vector.broadcast %cst_11 : f32 to vector<8x128xf32>
    %52 = arith.subf %51, %45 : vector<8x128xf32>
    %53 = arith.mulf %52, %50 : vector<8x128xf32>
    %c152 = arith.constant 152 : index
    %c0_12 = arith.constant 0 : index
    %54 = vector.load %arg1[%c152, %c0_12] : memref<288x384xf32, #tpu.memory_space<vmem>>, vector<128x256xf32>
    %cst_13 = arith.constant dense<0.000000e+00> : vector<8x256xf32>
    %55 = tpu.matmul %53, %54, %cst_13 {dimension_numbers = #tpu.dot_dimension_numbers<[1], [0], [0], [1], [0, 0, 1, 1], [], []>} : vector<8x128xf32>, vector<128x256xf32>, vector<8x256xf32> -> vector<8x256xf32>
    %56 = vector.extract_strided_slice %55 {offsets = [0, 128], sizes = [8, 128], strides = [1, 1]} : vector<8x256xf32> to vector<8x128xf32>
    %57 = math.tanh %56 : vector<8x128xf32>
    %58 = math.exp %57 : vector<8x128xf32>
    %cst_14 = arith.constant dense<0.000000e+00> : vector<128xf32>
    %59 = vector.multi_reduction <add>, %58, %cst_14 [0] : vector<8x128xf32> to vector<128xf32>
    %60 = vector.shape_cast %59 : vector<128xf32> to vector<1x128xf32>
    %cst_15 = arith.constant 1.000000e-10 : f32
    %61 = vector.broadcast %cst_15 : f32 to vector<1x128xf32>
    %62 = arith.addf %60, %61 : vector<1x128xf32>
    %63 = arith.divf %60, %62 : vector<1x128xf32>
    %c280 = arith.constant 280 : index
    %c0_16 = arith.constant 0 : index
    %64 = vector.load %arg1[%c280, %c0_16] : memref<288x384xf32, #tpu.memory_space<vmem>>, vector<1x128xf32>
    %65 = vector.extract_strided_slice %55 {offsets = [0, 0], sizes = [8, 128], strides = [1, 1]} : vector<8x256xf32> to vector<8x128xf32>
    %66 = vector.broadcast %63 : vector<1x128xf32> to vector<8x128xf32>
    %67 = arith.mulf %65, %66 : vector<8x128xf32>
    %68 = vector.broadcast %64 : vector<1x128xf32> to vector<8x128xf32>
    %69 = arith.addf %67, %68 : vector<8x128xf32>
    %c0_17 = arith.constant 0 : index
    %c0_18 = arith.constant 0 : index
    %70 = vector.load %arg2[%c0_17, %c0_18] : memref<8x128xf32, #tpu.memory_space<vmem>>, vector<8x128xf32>
    tpu.vector_store %arg2[%c0_17, %c0_18], %69 {strides = array<i32>} : memref<8x128xf32, #tpu.memory_space<vmem>>, vector<8x128xf32>,
    return
  }
}

</mosaic_0001>

<bundles_post_ra>
// kernel: tpu_custom_call.1
= control target key start
LH: loop header
LB: loop body
LE: loop exit
PB: predicated region body
PF: predicated region fallthrough
CT: control target
= control target key end

     0   :  { %7 = vsyncpa [#allocation3], 0  ;;  %s596_s0 = inlined_call_operand.hbm [shape: f32[8,16], index: 0, kind: input, shape index: {}]   ;;  %s597_s1 = inlined_call_operand.hbm [shape: f32[288,384], index: 1, kind: input, shape index: {}]   ;;  %s598_s2 = inlined_call_operand.hbm [shape: f32[8,128], index: 2, kind: output, shape index: {}]  }
   0x1   :  { %8 = vsyncpa [#allocation6], 0 }
   0x2   :  { %9 = vsyncpa [#allocation4], 0  ;;  %s15_s11 = sshll.u32 %s596_s0, 4  ;;  %s553_s12 = smov [#allocation2]   ;;  %s16_s11 = int_to_ptr.hbm [resolvable:$true] %s15_s11 }
   0x3   :  { %s17_s13 = sshll.u32 %s553_s12, 4  ;;  %s25_s16 = sshll.u32 %s597_s1, 4  ;;  %s18_s13 = int_to_ptr.vmem [resolvable:$true] %s17_s13  ;;  %s26_s16 = int_to_ptr.hbm [resolvable:$true] %s25_s16 }
   0x4   :  { %20 = dma.hbm_to_vmem [thread:$0]  %s16_s11, 128, %s18_s13, [#allocation3]  }
   0x5   :  { %s554_s17 = smov [#allocation5]   ;;  %s555_s19 = smov 384  }
   0x6   :  { %s27_s18 = sshll.u32 %s554_s17, 4  ;;  %s556_s20 = smov 24   ;;  %s28_s18 = int_to_ptr.vmem [resolvable:$true] %s27_s18 }
   0x7   :  { %33 = dma.hbm_to_vmem [thread:$0]  %s26_s16, 13824, %s28_s18, [#allocation6], %s555_s19, %s555_s19, %s556_s20  }
   0x8   :  { %547 = dma.done.wait [#allocation3], 128  }
   0x9   :  { %548 = vsyncadd [#allocation3], 4294967168 }
   0xa   :  { %549 = dma.done.wait [#allocation6], 13824  }
   0xb   :  { %550 = vsyncadd [#allocation6], 4294953472  ;;  %v49_v0 = vld [vmem:[#allocation5 + $0x18] sm:$0xff]  ;;  %v50_v1 = vld [vmem:[#allocation5 + $0x20] sm:$0xff]  ;;  %vm55_vm0 = vcmask 130048   ;;  %s557_s0 = smov [#allocation7]  }
   0xc   :  { %v46_v2 = vld [vmem:[#allocation5] sm:$0xff]  ;;  %73 = vmatpush.msra.mxu0 %v49_v0  ;;  %93 = vmatpush.msra.mxu1 %v50_v1  ;;  %v47_v3 = vld [vmem:[#allocation5 + $0x8] sm:$0xff]  ;;  %v45_v4 = vld [vmem:[#allocation2] sm:$0xff]  ;;  %s424_s1 = sshll.u32 %s557_s0, 4  ;;  %s426_s23 = sshll.u32 %s598_s2, 4  ;;  %s425_s1 = int_to_ptr.vmem [resolvable:$true] %s424_s1  ;;  %s427_s23 = int_to_ptr.hbm [resolvable:$true] %s426_s23 }
   0xd   :  { %v51_v5 = vld [vmem:[#allocation5 + $0x28] sm:$0xff]  ;;  %v48_v6 = vld [vmem:[#allocation5 + $0x10] sm:$0xff]  ;;  %v208_v7 = vld [vmem:[#allocation5 + $0x198] sm:$0xff] }
   0xe   :  { %113 = vmatpush.msra.mxu2 %v51_v5  ;;  %74 = vmatpush.msra.mxu0 %v46_v2  ;;  %v209_v8 = vld [vmem:[#allocation5 + $0x1a0] sm:$0xff]  ;;  %v210_v9 = vld [vmem:[#allocation5 + $0x1a8] sm:$0xff]  ;;  %v207_v12 = vld [vmem:[#allocation5 + $0x190] sm:$0xff] }
   0xf   :  { %94 = vmatpush.msra.mxu1 %v47_v3  ;;  %437 = vmatmul.msk.f32.vlgmr.msra.gmra.mxu0 %vm55_vm0, %v45_v4  ;;  %v205_v10 = vld [vmem:[#allocation5 + $0x180] sm:$0xff]  ;;  %v206_v11 = vld [vmem:[#allocation5 + $0x188] sm:$0xff]  ;;  %v203_v14 = vld [vmem:[#allocation5 + $0x170] sm:$0xff] }
  0x10   :  { %438 = vmatmul.msk.f32.vlgmr.msra.gmra.mxu1 %vm55_vm0, %v45_v4  ;;  %114 = vmatpush.msra.mxu2 %v48_v6  ;;  %v202_v13 = vld [vmem:[#allocation5 + $0x168] sm:$0xff]  ;;  %v204_v15 = vld [vmem:[#allocation5 + $0x178] sm:$0xff]  ;;  %v199_v16 = vld [vmem:[#allocation5 + $0x150] sm:$0xff] }
  0x11   :  { %439 = vmatmul.msk.f32.vlgmr.msra.gmra.mxu2 %vm55_vm0, %v45_v4  ;;  %214 = vmatpush.msra.mxu3 %v208_v7  ;;  %v200_v17 = vld [vmem:[#allocation5 + $0x158] sm:$0xff]  ;;  %v201_v18 = vld [vmem:[#allocation5 + $0x160] sm:$0xff]  ;;  %v198_v21 = vld [vmem:[#allocation5 + $0x148] sm:$0xff] }
  0x12   :  { %234 = vmatpush.msrb.mxu0 %v209_v8  ;;  %254 = vmatpush.msrb.mxu1 %v210_v9  ;;  %v196_v19 = vld [vmem:[#allocation5 + $0x138] sm:$0xff]  ;;  %v197_v20 = vld [vmem:[#allocation5 + $0x140] sm:$0xff]  ;;  %v194_v23 = vld [vmem:[#allocation5 + $0x128] sm:$0xff] }
  0x13   :  { %215 = vmatpush.msra.mxu3 %v205_v10  ;;  %v193_v22 = vld [vmem:[#allocation5 + $0x120] sm:$0xff]  ;;  %v195_v24 = vld [vmem:[#allocation5 + $0x130] sm:$0xff]  ;;  %v190_v25 = vld [vmem:[#allocation5 + $0x108] sm:$0xff] }
  0x14   :  { %235 = vmatpush.msrb.mxu0 %v206_v11  ;;  %255 = vmatpush.msrb.mxu1 %v207_v12  ;;  %v191_v26 = vld [vmem:[#allocation5 + $0x110] sm:$0xff]  ;;  %v192_v27 = vld [vmem:[#allocation5 + $0x118] sm:$0xff]  ;;  %v189_v32 = vld [vmem:[#allocation5 + $0x100] sm:$0xff] }
  0x15   :  { %216 = vmatpush.msra.mxu3 %v202_v13  ;;  %v187_v28 = vld [vmem:[#allocation5 + $0xf0] sm:$0xff]  ;;  %v188_v29 = vld [vmem:[#allocation5 + $0xf8] sm:$0xff]  ;;  %v185_v34 = vld [vmem:[#allocation5 + $0xe0] sm:$0xff] }
  0x16   :  { %236 = vmatpush.msrb.mxu0 %v203_v14  ;;  %256 = vmatpush.msrb.mxu1 %v204_v15  ;;  %v579_v30 = vld [vmem:[#allocation5 + $0x1b0] sm:$0xff]  ;;  %v581_v31 = vld [vmem:[#allocation5 + $0x1b8] sm:$0xff]  ;;  %v186_v35 = vld [vmem:[#allocation5 + $0xe8] sm:$0xff] }
  0x17   :  { %217 = vmatpush.msra.mxu3 %v199_v16  ;;  %v184_v33 = vld [vmem:[#allocation5 + $0xd8] sm:$0xff]  ;;  %v52_v36 = vperm.slane %v579_v30, 0  ;;  %v53_v37 = vperm.slane %v581_v31, 0  ;;  %v181_v38 = vld [vmem:[#allocation5 + $0xc0] sm:$0xff]  ;;  %v182_v39 = vld [vmem:[#allocation5 + $0xc8] sm:$0xff] }
  0x18   :  { %237 = vmatpush.msrb.mxu0 %v200_v17  ;;  %257 = vmatpush.msrb.mxu1 %v201_v18  ;;  %v183_v40 = vld [vmem:[#allocation5 + $0xd0] sm:$0xff]  ;;  %v178_v45 = vld [vmem:[#allocation5 + $0xa8] sm:$0xff]  ;;  %v180_v47 = vld [vmem:[#allocation5 + $0xb8] sm:$0xff] }
  0x19   :  { %218 = vmatpush.msra.mxu3 %v196_v19  ;;  %v179_v46 = vld [vmem:[#allocation5 + $0xb0] sm:$0xff]  ;;  %v176_v51 = vld [vmem:[#allocation5 + $0x98] sm:$0xff]  ;;  %v177_v52 = vld [vmem:[#allocation5 + $0xa0] sm:$0xff]  ;;  %v157_v19 = vperm.slane %v579_v30, 1 }
  0x1a   :  { %238 = vmatpush.msrb.mxu0 %v197_v20  ;;  %258 = vmatpush.msrb.mxu1 %v198_v21  ;;  %v175_v50 = vld [vmem:[#allocation5 + $0x90] sm:$0xff]  ;;  %v172_v53 = vld [vmem:[#allocation5 + $0x78] sm:$0xff]  ;;  %v173_v54 = vld [vmem:[#allocation5 + $0x80] sm:$0xff] }
  0x1b   :  { %219 = vmatpush.msra.mxu3 %v193_v22  ;;  %v174_v55 = vld [vmem:[#allocation5 + $0x88] sm:$0xff]  ;;  %v169_v56 = vld [vmem:[#allocation5 + $0x60] sm:$0xff]  ;;  %v171_v58 = vld [vmem:[#allocation5 + $0x70] sm:$0xff] }
  0x1c   :  { %239 = vmatpush.msrb.mxu0 %v194_v23  ;;  %259 = vmatpush.msrb.mxu1 %v195_v24  ;;  %v170_v57 = vld [vmem:[#allocation5 + $0x68] sm:$0xff]  ;;  %v167_v60 = vld [vmem:[#allocation5 + $0x50] sm:$0xff]  ;;  %v168_v61 = vld [vmem:[#allocation5 + $0x58] sm:$0xff] }
  0x1d   :  { %220 = vmatpush.msra.mxu3 %v190_v25  ;;  %v166_v59 = vld [vmem:[#allocation5 + $0x48] sm:$0xff]  ;;  %v163_v62 = vld [vmem:[#allocation5 + $0x30] sm:$0xff]  ;;  %v164_v63 = vld [vmem:[#allocation5 + $0x38] sm:$0xff] }
  0x1e   :  { %240 = vmatpush.msrb.mxu0 %v191_v26  ;;  %260 = vmatpush.msrb.mxu1 %v192_v27  ;;  %v165_v0 = vld [vmem:[#allocation5 + $0x40] sm:$0xff] }
  0x1f   :  { %221 = vmatpush.msra.mxu3 %v187_v28  ;;  %v585_v9 = vld [vmem:[#allocation5 + $0x1c0] sm:$0xff] }
  0x20   :  { %241 = vmatpush.msrb.mxu0 %v188_v29  ;;  %261 = vmatpush.msrb.mxu1 %v189_v32  ;;  %v54_v13 = vperm.slane %v585_v9, 0 }
  0x21   :  { %222 = vmatpush.msra.mxu3 %v184_v33 }
  0x22   :  { %242 = vmatpush.msrb.mxu0 %v185_v34  ;;  %262 = vmatpush.msrb.mxu1 %v186_v35 }
  0x23   :  { %223 = vmatpush.msra.mxu3 %v181_v38  ;;  %v349_v38 = vld [vmem:[#allocation5 + $0x338] sm:$0xff] }
  0x24   :  { %243 = vmatpush.msrb.mxu0 %v182_v39  ;;  %263 = vmatpush.msrb.mxu1 %v183_v40  ;;  %v346_v39 = vld [vmem:[#allocation5 + $0x318] sm:$0xff]  ;;  %v347_v40 = vld [vmem:[#allocation5 + $0x320] sm:$0xff] }
  0x25   :  { %224 = vmatpush.msra.mxu3 %v178_v45  ;;  %v340_v45 = vld [vmem:[#allocation5 + $0x2d0] sm:$0xff] }
  0x26   :  { %244 = vmatpush.msrb.mxu0 %v179_v46  ;;  %264 = vmatpush.msrb.mxu1 %v180_v47  ;;  %v341_v46 = vld [vmem:[#allocation5 + $0x2d8] sm:$0xff]  ;;  %v212_v47 = vperm.slane %v581_v31, 2 }
  0x27   :  { %225 = vmatpush.msra.mxu3 %v175_v50  ;;  %v336_v50 = vld [vmem:[#allocation5 + $0x2a0] sm:$0xff]  ;;  %v330_v31 = vld [vmem:[#allocation5 + $0x258] sm:$0xff] }
  0x28   :  { %245 = vmatpush.msrb.mxu0 %v176_v51  ;;  %265 = vmatpush.msrb.mxu1 %v177_v52  ;;  %v337_v51 = vld [vmem:[#allocation5 + $0x2a8] sm:$0xff] }
  0x29   :  { %226 = vmatpush.msra.mxu3 %v172_v53 }
  0x2a   :  { %246 = vmatpush.msrb.mxu0 %v173_v54  ;;  %266 = vmatpush.msrb.mxu1 %v174_v55  ;;  %v334_v54 = vld [vmem:[#allocation5 + $0x288] sm:$0xff]  ;;  %v335_v55 = vld [vmem:[#allocation5 + $0x290] sm:$0xff] }
  0x2b   :  { %227 = vmatpush.msra.mxu3 %v169_v56  ;;  %v332_v56 = vld [vmem:[#allocation5 + $0x270] sm:$0xff] }
  0x2c   :  { %247 = vmatpush.msrb.mxu0 %v170_v57  ;;  %267 = vmatpush.msrb.mxu1 %v171_v58  ;;  %v333_v57 = vld [vmem:[#allocation5 + $0x278] sm:$0xff] }
  0x2d   :  { %228 = vmatpush.msra.mxu3 %v166_v59  ;;  %v211_v59 = vperm.slane %v579_v30, 2 }
  0x2e   :  { %248 = vmatpush.msrb.mxu0 %v167_v60  ;;  %268 = vmatpush.msrb.mxu1 %v168_v61  ;;  %v331_v60 = vld [vmem:[#allocation5 + $0x260] sm:$0xff] }
  0x2f   :  { %229 = vmatpush.msra.mxu3 %v163_v62  ;;  %v328_v61 = vld [vmem:[#allocation5 + $0x240] sm:$0xff]  ;;  %v329_v62 = vld [vmem:[#allocation5 + $0x248] sm:$0xff] }
  0x30   :  { %249 = vmatpush.msrb.mxu0 %v164_v63  ;;  %269 = vmatpush.msrb.mxu1 %v165_v0 }
  0x31   :  { %370 = vmatpush.msrb.mxu3 %v349_v38 }
  0x33   :  { %371 = vmatpush.msrb.mxu3 %v347_v40 }
  0x8c   :  { %v76_v41 = vpop.f32.mrf.mxu0 }
  0x8d   :  { %v96_v42 = vpop.f32.mrf.mxu1  ;;  %v77_v43 = vadd.f32 %v76_v41, %v52_v36  ;;  %v344_v41 = vld [vmem:[#allocation5 + $0x300] sm:$0xff] }
  0x8e   :  { %v97_v44 = vadd.f32 %v96_v42, %v53_v37  ;;  %v348_v37 = vld [vmem:[#allocation5 + $0x330] sm:$0xff]  ;;  %v345_v42 = vld [vmem:[#allocation5 + $0x308] sm:$0xff] }
  0x8f   :  { %v440_v48 = vmul.f32 -1.442695, %v77_v43  ;;  %350 = vmatpush.msrb.mxu2 %v348_v37  ;;  %372 = vmatpush.msrb.mxu3 %v345_v42  ;;  %v342_v43 = vld [vmem:[#allocation5 + $0x2e8] sm:$0xff] }
  0x90   :  { %v441_v49 = vmul.f32 -1.442695, %v97_v44  ;;  %v343_v44 = vld [vmem:[#allocation5 + $0x2f0] sm:$0xff] }
  0x91   :  { %449 = vpow2.f32 %v440_v48  ;;  %351 = vmatpush.msrb.mxu2 %v346_v39  ;;  %373 = vmatpush.msrb.mxu3 %v343_v44  ;;  %v338_v48 = vld [vmem:[#allocation5 + $0x2b8] sm:$0xff] }
  0x92   :  { %451 = vpow2.f32 %v441_v49  ;;  %v339_v49 = vld [vmem:[#allocation5 + $0x2c0] sm:$0xff] }
  0x93   :  { %352 = vmatpush.msrb.mxu2 %v344_v41  ;;  %374 = vmatpush.msrb.mxu3 %v341_v46 }
  0x94   :  { %v116_v16 = vpop.f32.mrf.mxu2 }
  0x95   :  { %v117_v21 = vadd.f32 %v116_v16, %v54_v13  ;;  %353 = vmatpush.msrb.mxu2 %v342_v43  ;;  %375 = vmatpush.msrb.mxu3 %v339_v49  ;;  %v318_v13 = vld [vmem:[#allocation5 + $0x1c8] sm:$0xff] }
  0x97   :  { %v450_v1 = vpop.eup %449  ;;  %354 = vmatpush.msrb.mxu2 %v340_v45  ;;  %376 = vmatpush.msrb.mxu3 %v337_v51 }
  0x98   :  { %v452_v2 = vpop.eup %451  ;;  %v122_v3 = vadd.f32 1.0, %v450_v1  ;;  %v326_v1 = vld [vmem:[#allocation5 + $0x228] sm:$0xff] }
  0x99   :  { %v141_v4 = vadd.f32 1.0, %v452_v2  ;;  %355 = vmatpush.msrb.mxu2 %v338_v48  ;;  %377 = vmatpush.msrb.mxu3 %v335_v55  ;;  %v327_v2 = vld [vmem:[#allocation5 + $0x230] sm:$0xff] }
  0x9a   :  { %453 = vrcp.f32 %v122_v3  ;;  %v134_v12 = vand.u32 2147483648, %v122_v3  ;;  %v132_v15 = vand.u32 2147483647, %v122_v3  ;;  %vm128_vm2 = vweird.f32 %v122_v3 }
  0x9b   :  { %455 = vrcp.f32 %v141_v4  ;;  %vm147_vm5 = vweird.f32 %v141_v4  ;;  %v153_v26 = vand.u32 2147483648, %v141_v4  ;;  %v151_v27 = vand.u32 2147483647, %v141_v4  ;;  %356 = vmatpush.msrb.mxu2 %v336_v50  ;;  %378 = vmatpush.msrb.mxu3 %v333_v57 }
  0x9c   :  { %v135_v20 = vor.u32 1.1754944e-38, %v134_v12  ;;  %vm133_vm4 = vcmp.eq.f32.partialorder %v132_v15, 8.507059e+37  ;;  %v321_v12 = vld [vmem:[#allocation5 + $0x1e8] sm:$0xff] }
  0x9d   :  { %v154_v32 = vor.u32 1.1754944e-38, %v153_v26  ;;  %vm152_vm8 = vcmp.eq.f32.partialorder %v151_v27, 8.507059e+37  ;;  %357 = vmatpush.msrb.mxu2 %v334_v54  ;;  %379 = vmatpush.msrb.mxu3 %v331_v60  ;;  %v312_v27 = vperm.slane %v579_v30, 3 }
  0x9f   :  { %358 = vmatpush.msrb.mxu2 %v332_v56  ;;  %380 = vmatpush.msrb.mxu3 %v329_v62 }
  0xa0   :  { %v454_v5 = vpop.eup %453 }
  0xa1   :  { %v456_v6 = vpop.eup %455  ;;  %v124_v7 = vmul.f32 %v454_v5, %v122_v3  ;;  %vm129_vm1 = vweird.f32 %v454_v5  ;;  %359 = vmatpush.msrb.mxu2 %v330_v31  ;;  %381 = vmatpush.msrb.mxu3 %v327_v2 }
  0xa2   :  { %v143_v8 = vmul.f32 %v456_v6, %v141_v4  ;;  %vm130_vm3 = vmor %vm128_vm2, %vm129_vm1  ;;  %vm148_vm6 = vweird.f32 %v456_v6  ;;  %v324_v4 = vld [vmem:[#allocation5 + $0x210] sm:$0xff] }
  0xa3   :  { %v125_v10 = vsub.f32 1.0, %v124_v7  ;;  %vm149_vm7 = vmor %vm147_vm5, %vm148_vm6  ;;  %360 = vmatpush.msrb.mxu2 %v328_v61  ;;  %v322_v7 = vld [vmem:[#allocation5 + $0x1f8] sm:$0xff] }
  0xa4   :  { %v144_v11 = vsub.f32 1.0, %v143_v8  ;;  %v323_v8 = vld [vmem:[#allocation5 + $0x200] sm:$0xff] }
  0xa5   :  { %v126_v14 = vmul.f32 %v454_v5, %v125_v10  ;;  %361 = vmatpush.msrb.mxu2 %v326_v1 }
  0xa6   :  { %v145_v17 = vmul.f32 %v456_v6, %v144_v11  ;;  %v320_v11 = vld [vmem:[#allocation5 + $0x1e0] sm:$0xff] }
  0xa7   :  { %v127_v18 = vadd.f32 %v454_v5, %v126_v14  ;;  %362 = vmatpush.msrb.mxu2 %v324_v4  ;;  %v319_v14 = vld [vmem:[#allocation5 + $0x1d0] sm:$0xff]  ;;  %v415_v4 = vld [vmem:[#allocation5 + $0x348] ss:$0 sm:$0xff] }
  0xa8   :  { %v146_v24 = vadd.f32 %v456_v6, %v145_v17 }
  0xa9   :  { %v131_v22 = vsel %vm130_vm3, %v454_v5, %v127_v18  ;;  %v325_v5 = vld [vmem:[#allocation5 + $0x218] sm:$0xff]  ;;  %363 = vmatpush.msrb.mxu2 %v322_v7 }
  0xaa   :  { %v136_v23 = vsel %vm133_vm4, %v135_v20, %v131_v22  ;;  %v150_v29 = vsel %vm149_vm7, %v456_v6, %v146_v24  ;;  %382 = vmatpush.msrb.mxu3 %v325_v5 }
  0xab   :  { %v158_v25 = vmul.f32 %v157_v19, %v136_v23  ;;  %v155_v33 = vsel %vm152_vm8, %v154_v32, %v150_v29  ;;  %364 = vmatpush.msrb.mxu2 %v320_v11 }
  0xac   :  { %v161_v34 = vsub.f32 1.0, %v155_v33  ;;  %383 = vmatpush.msrb.mxu3 %v323_v8 }
  0xad   :  { %v159_v28 = vadd.f32 %v158_v25, %v117_v21  ;;  %365 = vmatpush.msrb.mxu2 %v318_v13 }
  0xae   :  { %384 = vmatpush.msrb.mxu3 %v321_v12 }
  0xaf   :  { %457 = vtanh.f32 %v159_v28  ;;  %v213_v28 = vperm.slane %v585_v9, 2 }
  0xb0   :  { %385 = vmatpush.msrb.mxu3 %v319_v14 }
  0xb5   :  { %v458_v35 = vpop.eup %457 }
  0xb6   :  { %v162_v36 = vmul.f32 %v458_v35, %v161_v34 }
  0xb8   :  { %230 = vmatmul.f32.vlgmr.msra.gmra.mxu3 %v162_v36  ;;  %250 = vmatmul.f32.vlgmr.msrb.gmra.mxu0 %v162_v36 }
  0xb9   :  { %270 = vmatmul.f32.vlgmr.msrb.gmra.mxu1 %v162_v36 }
 0x135   :  { %v251_v52 = vpop.f32.mrf.mxu0 }
 0x136   :  { %v252_v53 = vadd.f32 %v251_v52, %v212_v47  ;;  %v271_v32 = vpop.f32.mrf.mxu1 }
 0x137   :  { %v272_v37 = vadd.f32 %v271_v32, %v213_v28 }
 0x138   :  { %v443_v58 = vmul.f32 -1.442695, %v252_v53 }
 0x13a   :  { %459 = vpow2.f32 %v443_v58 }
 0x13b   :  { %v231_v63 = vpop.f32.mrf.mxu3 }
 0x13c   :  { %v232_v0 = vadd.f32 %v231_v63, %v211_v59 }
 0x13e   :  { %v442_v3 = vmul.f32 -1.442695, %v232_v0 }
 0x140   :  { %v460_v6 = vpop.eup %459  ;;  %461 = vpow2.f32 %v442_v3 }
 0x141   :  { %v296_v10 = vadd.f32 1.0, %v460_v6 }
 0x143   :  { %463 = vrcp.f32 %v296_v10  ;;  %v308_v38 = vand.u32 2147483648, %v296_v10  ;;  %vm302_vm14 = vweird.f32 %v296_v10  ;;  %v306_v40 = vand.u32 2147483647, %v296_v10 }
 0x145   :  { %v309_v42 = vor.u32 1.1754944e-38, %v308_v38  ;;  %vm307_vm0 = vcmp.eq.f32.partialorder %v306_v40, 8.507059e+37 }
 0x146   :  { %v462_v15 = vpop.eup %461 }
 0x147   :  { %v277_v16 = vadd.f32 1.0, %v462_v15 }
 0x149   :  { %465 = vrcp.f32 %v277_v16  ;;  %v464_v17 = vpop.eup %463  ;;  %v289_v23 = vand.u32 2147483648, %v277_v16  ;;  %v287_v25 = vand.u32 2147483647, %v277_v16  ;;  %vm283_vm10 = vweird.f32 %v277_v16 }
 0x14a   :  { %v298_v18 = vmul.f32 %v464_v17, %v296_v10  ;;  %vm303_vm13 = vweird.f32 %v464_v17 }
 0x14b   :  { %v290_v33 = vor.u32 1.1754944e-38, %v289_v23  ;;  %vm288_vm12 = vcmp.eq.f32.partialorder %v287_v25, 8.507059e+37  ;;  %vm304_vm15 = vmor %vm302_vm14, %vm303_vm13 }
 0x14c   :  { %v299_v21 = vsub.f32 1.0, %v298_v18 }
 0x14e   :  { %v300_v26 = vmul.f32 %v464_v17, %v299_v21 }
 0x14f   :  { %v466_v19 = vpop.eup %465 }
 0x150   :  { %v279_v20 = vmul.f32 %v466_v19, %v277_v16  ;;  %vm284_vm9 = vweird.f32 %v466_v19  ;;  %v301_v36 = vadd.f32 %v464_v17, %v300_v26 }
 0x151   :  { %vm285_vm11 = vmor %vm283_vm10, %vm284_vm9 }
 0x152   :  { %v280_v22 = vsub.f32 1.0, %v279_v20  ;;  %v305_v30 = vsel %vm304_vm15, %v464_v17, %v301_v36 }
 0x153   :  { %v310_v9 = vsel %vm307_vm0, %v309_v42, %v305_v30 }
 0x154   :  { %v281_v24 = vmul.f32 %v466_v19, %v280_v22  ;;  %v316_v43 = vsub.f32 1.0, %v310_v9 }
 0x156   :  { %v282_v29 = vadd.f32 %v466_v19, %v281_v24 }
 0x158   :  { %v286_v34 = vsel %vm285_vm11, %v466_v19, %v282_v29 }
 0x159   :  { %v291_v35 = vsel %vm288_vm12, %v290_v33, %v286_v34 }
 0x15a   :  { %v313_v39 = vmul.f32 %v312_v27, %v291_v35 }
 0x15c   :  { %v314_v41 = vadd.f32 %v313_v39, %v272_v37 }
 0x15e   :  { %467 = vtanh.f32 %v314_v41 }
 0x164   :  { %v468_v44 = vpop.eup %467 }
 0x165   :  { %v317_v45 = vmul.f32 %v468_v44, %v316_v43 }
 0x167   :  { %366 = vmatmul.f32.vlgmr.msrb.gmra.mxu2 %v317_v45  ;;  %386 = vmatmul.f32.vlgmr.msrb.gmra.mxu3 %v317_v45 }
 0x1ea   :  { %v387_v46 = vpop.f32.mrf.mxu3  ;;  %v367_v3 = vpop.f32.mrf.mxu2 }
 0x1eb   :  { %469 = vtanh.f32 %v387_v46 }
 0x1f1   :  { %v470_v47 = vpop.eup %469 }
 0x1f2   :  { %v391_v48 = vmul.f32 1.442695, %v470_v47 }
 0x1f4   :  { %471 = vpow2.f32 %v391_v48 }
 0x1fa   :  { %v472_v49 = vpop.eup %471 }
 0x1fb   :  { %v393_v50 = vrot.slane %v472_v49, 4 }
 0x1fd   :  { %v394_v51 = vadd.f32 %v472_v49, %v393_v50 }
 0x1ff   :  { %v395_v52 = vrot.slane %v394_v51, 2 }
 0x201   :  { %v396_v53 = vadd.f32 %v395_v52, %v394_v51 }
 0x203   :  { %v397_v54 = vrot.slane %v396_v53, 1 }
 0x205   :  { %v398_v55 = vadd.f32 %v397_v54, %v396_v53 }
 0x207   :  { %v399_v56 = vadd.f32 1e-10, %v398_v55 }
 0x209   :  { %473 = vrcp.f32 %v399_v56  ;;  %v411_v31 = vand.u32 2147483648, %v399_v56  ;;  %v409_v61 = vand.u32 2147483647, %v399_v56  ;;  %vm405_vm2 = vweird.f32 %v399_v56 }
 0x20b   :  { %v412_v63 = vor.u32 1.1754944e-38, %v411_v31  ;;  %vm410_vm4 = vcmp.eq.f32.partialorder %v409_v61, 8.507059e+37 }
 0x20f   :  { %v474_v57 = vpop.eup %473 }
 0x210   :  { %v401_v58 = vmul.f32 %v474_v57, %v399_v56  ;;  %vm406_vm1 = vweird.f32 %v474_v57 }
 0x211   :  { %vm407_vm3 = vmor %vm405_vm2, %vm406_vm1 }
 0x212   :  { %v402_v59 = vsub.f32 1.0, %v401_v58 }
 0x214   :  { %v403_v60 = vmul.f32 %v474_v57, %v402_v59 }
 0x216   :  { %v404_v62 = vadd.f32 %v474_v57, %v403_v60 }
 0x218   :  { %v408_v0 = vsel %vm407_vm3, %v474_v57, %v404_v62 }
 0x219   :  { %v413_v1 = vsel %vm410_vm4, %v412_v63, %v408_v0 }
 0x21a   :  { %v414_v2 = vmul.f32 %v413_v1, %v398_v55 }
 0x21c   :  { %v416_v5 = vmul.f32 %v414_v2, %v367_v3 }
 0x21e   :  { %v417_v6 = vadd.f32 %v416_v5, %v415_v4 }
 0x220   :  { %418 = vst [vmem:[#allocation7] sm:$0xff] %v417_v6 }
 0x221   :  { %429 = dma.vmem_to_hbm [thread:$0]  %s425_s1, 128, %s427_s23, [#allocation4]  }
 0x222   :  { %551 = dma.done.wait [#allocation4], 128  }
 0x223   :  { %552 = vsyncadd [#allocation4], 4294967168 }
 0x224   :  { %434 = vsyncpa [#allocation3], 1 }
 0x225   :  { %435 = vsyncpa [#allocation6], 1 }
 0x226   :  { %436 = vsyncpa [#allocation4], 1 }

</bundles_post_ra>
